<compile_context>
chip_gen: v7x
topology: tpu7x:2x2x1
jax: 0.10.0
libtpu: 0.0.40
codegen_flags: <defaults>
</compile_context>

<pallas_src>
import jax
import jax.numpy as jnp
from jax.experimental import pallas as pl
from jax.experimental.pallas import tpu as pltpu

# Karate-club graph has 34 nodes and 2 clubs -> 2 classes. Hardcoded so the
# script stays self-contained (no networkx dependency needed).
NUM_NODES = 34
IN_FEATURES = 2
NUM_CLASSES = 2


def classifier_kernel(x_ref, w_ref, b_ref, o_ref):
    # x_ref: [F, N] (VMEM, lane-major)
    # w_ref: [C*F]  (SMEM scalars, row-major flatten of PyTorch [C, F] weight)
    # b_ref: [C]    (SMEM scalars)
    # o_ref: [C, N] (VMEM, lane-major)
    xr = jnp.maximum(x_ref[...], 0.0)          # ReLU, one vreg-wide VPU op
    x0 = xr[0:1, :]                            # [1, N]
    x1 = xr[1:2, :]                            # [1, N]

    # Weight/bias differences on the scalar ALU (free slot, no vector work).
    dw0 = w_ref[2] - w_ref[0]                  # w[1,0] - w[0,0]
    dw1 = w_ref[3] - w_ref[1]                  # w[1,1] - w[0,1]
    db = b_ref[1] - b_ref[0]                   # b[1]   - b[0]

    # d = logit1 - logit0 : 2 scalar-broadcast FMAs + 1 scalar-broadcast add.
    d = x0 * dw0 + x1 * dw1 + db               # [1, N]

    # Analytic 2-class log-softmax (exact, stable, no cross-lane reductions):
    #   out0 = -softplus(d), out1 = d - softplus(d)
    #   softplus(z) = max(z, 0) + log1p(exp(-|z|))   (exp/log1p share the EUP)
    sp = jnp.maximum(d, 0.0) + jnp.log1p(jnp.exp(-jnp.abs(d)))
    o_ref[0:1, :] = -sp
    o_ref[1:2, :] = d - sp


@jax.jit
def classifier_forward(x, weight, bias):
    # x: [N, F], weight: [C, F] (PyTorch Linear convention), bias: [C]
    n, f = x.shape
    c = weight.shape[0]
    # The analytic log-softmax in the kernel is specific to 2 classes / 2 feats.
    assert c == 2 and f == 2, "classifier_kernel requires Linear(2, 2)"

    # Wrapper-side layout plumbing (folded by XLA under this jit):
    # lane-major activations in, lane-major logits out, 1-D SMEM weights.
    x_t = x.T                                   # [F, N]
    w_flat = weight.reshape(-1)                 # [C*F]

    cost = pl.CostEstimate(
        flops=6 * n + 8,                        # relu + 2 FMAs + softplus adds
        transcendentals=2 * n,                  # exp + log1p per node
        bytes_accessed=4 * (f * n + c * n + c * f + c),
    )

    out_t = pl.pallas_call(
        classifier_kernel,
        out_shape=jax.ShapeDtypeStruct((c, n), jnp.float32),
        in_specs=[
            pl.BlockSpec((f, n), lambda: (0, 0)),                   # x -> VMEM
            pl.BlockSpec(memory_space=pltpu.MemorySpace.SMEM),      # w -> SMEM
            pl.BlockSpec(memory_space=pltpu.MemorySpace.SMEM),      # b -> SMEM
        ],
        out_specs=pl.BlockSpec((c, n), lambda: (0, 0)),
        cost_estimate=cost,
    )(x_t, w_flat, bias)

    return out_t.T                              # back to [N, C] (PyTorch layout)


if __name__ == "__main__":
    key = jax.random.PRNGKey(0)
    kx, kw, kb = jax.random.split(key, 3)

    # Node embeddings: [34, 2] (e.g. learned 2-D GNN embeddings per node).
    x = jax.random.normal(kx, (NUM_NODES, IN_FEATURES), dtype=jnp.float32)

    # Deterministic Linear(2, 2) init, mimicking PyTorch's default
    # U(-1/sqrt(in_features), 1/sqrt(in_features)).
    bound = 1.0 / (IN_FEATURES ** 0.5)
    weight = jax.random.uniform(kw, (NUM_CLASSES, IN_FEATURES),
                                minval=-bound, maxval=bound, dtype=jnp.float32)
    bias = jax.random.uniform(kb, (NUM_CLASSES,),
                              minval=-bound, maxval=bound, dtype=jnp.float32)

    out = classifier_forward(x, weight, bias)
    out = jax.block_until_ready(out)

    # Sanity check against plain-JAX reference (relu -> linear -> log_softmax).
    xr = jnp.maximum(x, 0.0)
    logits = xr @ weight.T + bias
    ref = logits - jax.scipy.special.logsumexp(logits, axis=1, keepdims=True)
    assert out.shape == (NUM_NODES, NUM_CLASSES)
    assert jnp.allclose(out, ref, atol=1e-5, rtol=1e-5)

    print("KERNEL_OK")
</pallas_src>

<mosaic_0001>
module attributes {stable_mosaic.version = 11 : i64} {
  func.func @classifier_kernel(%arg0: memref<2x34xf32, #tpu.memory_space<vmem>>, %arg1: memref<4xf32, #tpu.memory_space<smem>>, %arg2: memref<2xf32, #tpu.memory_space<smem>>, %arg3: memref<2x34xf32, #tpu.memory_space<vmem>>) attributes {dimension_semantics = [], scalar_prefetch = 0 : i64, scratch_operands = 0 : i64, tpu.core_type = #tpu.core_type<tc>} {
    %c0 = arith.constant 0 : index
    %c0_0 = arith.constant 0 : index
    %0 = vector.load %arg0[%c0, %c0_0] : memref<2x34xf32, #tpu.memory_space<vmem>>, vector<2x34xf32>
    %cst = arith.constant 0.000000e+00 : f32
    %1 = vector.broadcast %cst : f32 to vector<2x34xf32>
    %2 = arith.maximumf %0, %1 : vector<2x34xf32>
    %3 = vector.extract_strided_slice %2 {offsets = [0, 0], sizes = [1, 34], strides = [1, 1]} : vector<2x34xf32> to vector<1x34xf32>
    %4 = vector.extract_strided_slice %2 {offsets = [1, 0], sizes = [1, 34], strides = [1, 1]} : vector<2x34xf32> to vector<1x34xf32>
    %c2 = arith.constant 2 : index
    %5 = memref.load %arg1[%c2] : memref<4xf32, #tpu.memory_space<smem>>
    %c0_1 = arith.constant 0 : index
    %6 = memref.load %arg1[%c0_1] : memref<4xf32, #tpu.memory_space<smem>>
    %7 = arith.subf %5, %6 : f32
    %c3 = arith.constant 3 : index
    %8 = memref.load %arg1[%c3] : memref<4xf32, #tpu.memory_space<smem>>
    %c1 = arith.constant 1 : index
    %9 = memref.load %arg1[%c1] : memref<4xf32, #tpu.memory_space<smem>>
    %10 = arith.subf %8, %9 : f32
    %c1_2 = arith.constant 1 : index
    %11 = memref.load %arg2[%c1_2] : memref<2xf32, #tpu.memory_space<smem>>
    %c0_3 = arith.constant 0 : index
    %12 = memref.load %arg2[%c0_3] : memref<2xf32, #tpu.memory_space<smem>>
    %13 = arith.subf %11, %12 : f32
    %14 = vector.broadcast %7 : f32 to vector<1x34xf32>
    %15 = arith.mulf %3, %14 : vector<1x34xf32>
    %16 = vector.broadcast %10 : f32 to vector<1x34xf32>
    %17 = arith.mulf %4, %16 : vector<1x34xf32>
    %18 = arith.addf %15, %17 : vector<1x34xf32>
    %19 = vector.broadcast %13 : f32 to vector<1x34xf32>
    %20 = arith.addf %18, %19 : vector<1x34xf32>
    %cst_4 = arith.constant 0.000000e+00 : f32
    %21 = vector.broadcast %cst_4 : f32 to vector<1x34xf32>
    %22 = arith.maximumf %20, %21 : vector<1x34xf32>
    %23 = math.absf %20 : vector<1x34xf32>
    %cst_5 = arith.constant 0.000000e+00 : f32
    %24 = vector.broadcast %cst_5 : f32 to vector<1x34xf32>
    %25 = arith.subf %24, %23 : vector<1x34xf32>
    %26 = math.exp %25 : vector<1x34xf32>
    %27 = math.log1p %26 : vector<1x34xf32>
    %28 = arith.addf %22, %27 : vector<1x34xf32>
    %cst_6 = arith.constant 0.000000e+00 : f32
    %29 = vector.broadcast %cst_6 : f32 to vector<1x34xf32>
    %30 = arith.subf %29, %28 : vector<1x34xf32>
    %c0_7 = arith.constant 0 : index
    %c0_8 = arith.constant 0 : index
    %31 = vector.load %arg3[%c0_7, %c0_8] : memref<2x34xf32, #tpu.memory_space<vmem>>, vector<1x34xf32>
    tpu.vector_store %arg3[%c0_7, %c0_8], %30 {strides = array<i32>} : memref<2x34xf32, #tpu.memory_space<vmem>>, vector<1x34xf32>,
    %32 = arith.subf %20, %28 : vector<1x34xf32>
    %c1_9 = arith.constant 1 : index
    %c0_10 = arith.constant 0 : index
    %33 = vector.load %arg3[%c1_9, %c0_10] : memref<2x34xf32, #tpu.memory_space<vmem>>, vector<1x34xf32>
    tpu.vector_store %arg3[%c1_9, %c0_10], %32 {strides = array<i32>} : memref<2x34xf32, #tpu.memory_space<vmem>>, vector<1x34xf32>,
    return
  }
}

</mosaic_0001>

<bundles_post_ra>
// kernel: classifier_forward.1
= control target key start
LH: loop header
LB: loop body
LE: loop exit
PB: predicated region body
PF: predicated region fallthrough
CT: control target
= control target key end

     0   :  { %8 = vsyncpa [#allocation4], 0  ;;  %s204_s0 = inlined_call_operand.vmem [shape: f32[2,34], index: 0, kind: input, shape index: {}]   ;;  %s205_s1 = inlined_call_operand.vmem [shape: f32[4], index: 1, kind: input, shape index: {}]   ;;  %s206_s2 = inlined_call_operand.vmem [shape: f32[2], index: 2, kind: input, shape index: {}]   ;;  %s207_s3 = inlined_call_operand.hbm [shape: f32[2,34], index: 3, kind: output, shape index: {}]  }
   0x1   :  { %9 = vsyncpa [#allocation6], 0 }
   0x2   :  { %10 = vsyncpa [#allocation3], 0  ;;  %s19_s14 = sshll.u32 %s205_s1, 4  ;;  %s29_s17 = sshll.u32 %s206_s2, 4  ;;  %s20_s14 = int_to_ptr.vmem [resolvable:$true] %s19_s14  ;;  %s30_s17 = int_to_ptr.vmem [resolvable:$true] %s29_s17 }
   0x3   :  { %s108_s18 = scalar_lea.vmem %s20_s14, 16  ;;  %p113_p1 = scmp.lt.s32.totalorder %s20_s14, %s20_s14 }
   0x4   :  { %p109_p0 = scmp.ne.s32.totalorder %s20_s14, %s108_s18  ;;  %p114_p2 = scmp.lt.s32.totalorder %s108_s18, %s108_s18 }
   0x6   :  { %p115_p3 = por %p114_p2, %p113_p1 }
   0x8   :  { %p116_p4 = pnand %p115_p3, %p109_p0 }
   0xa   :  { %119 = shalt.err (!%p116_p4)
}
   0xb   :  { %s160_s19 = smov [#allocation2]   ;;  %s120_s20 = scalar_lea.vmem %s30_s17, 16 }
   0xc   :  { %22 = dma.vmem_to_smem %s20_s14, 16, %s160_s19, [#allocation4]  }
   0xd   :  { %p121_p5 = scmp.ne.s32.totalorder %s30_s17, %s120_s20  ;;  %p125_p6 = scmp.lt.s32.totalorder %s30_s17, %s30_s17 }
   0xe   :  { %p126_p7 = scmp.lt.s32.totalorder %s120_s20, %s120_s20 }
  0x10   :  { %p127_p8 = por %p126_p7, %p125_p6 }
  0x12   :  { %p128_p9 = pnand %p127_p8, %p121_p5 }
  0x14   :  { %131 = shalt.err (!%p128_p9)
}
  0x15   :  { %s161_s1 = smov [#allocation5]  }
  0x16   :  { %32 = dma.vmem_to_smem %s30_s17, 16, %s161_s1, [#allocation6]  }
  0x17   :  { %154 = dma.done.wait [#allocation4], 16  }
  0x18   :  { %155 = vsyncadd [#allocation4], 4294967280 }
  0x19   :  { %156 = dma.done.wait [#allocation6], 16  }
  0x1a   :  { %157 = vsyncadd [#allocation6], 4294967280 }
  0x1b   :  { %39 = sfence }
  0x1c   :  { %s97_s2 = sld [smem:[#allocation2 + $0x2]]  ;;  %s43_s21 = sld [smem:[#allocation2]]  ;;  %v40_v0 = vld [vmem:[%s204_s0] sm:$0x3]  ;;  %vm77_vm1 = vcmask 270336  }
  0x1d   :  { %s98_s22 = sld [smem:[#allocation2 + $0x3]]  ;;  %s99_s23 = sld [smem:[#allocation2 + $0x1]]  ;;  %v41_v1 = vmax.f32 %v40_v0, 0.0 }
  0x1e   :  { %s100_s24 = sld [smem:[#allocation5 + $0x1]]  ;;  %s49_s25 = sld [smem:[#allocation5]] }
  0x1f   :  { %s162_s0 = smov [#allocation7]  }
  0x20   :  { %s87_s4 = sshll.u32 %s162_s0, 4  ;;  %s88_s4 = int_to_ptr.vmem [resolvable:$true] %s87_s4 }
  0x21   :  { %s132_s5 = scalar_lea.vmem %s88_s4, 32  ;;  %p137_p11 = scmp.lt.s32.totalorder %s88_s4, %s88_s4 }
  0x22   :  { %s44_s28 = ssub.f32 %s97_s2, %s43_s21  ;;  %p133_p10 = scmp.ne.s32.totalorder %s88_s4, %s132_s5 }
  0x23   :  { %s47_s29 = ssub.f32 %s98_s22, %s99_s23  ;;  %p138_p12 = scmp.lt.s32.totalorder %s132_s5, %s132_s5 }
  0x24   :  { %v51_v2 = vstv %s44_s28  ;;  %s50_s30 = ssub.f32 %s100_s24, %s49_s25 }
  0x25   :  { %v53_v3 = vstv %s47_s29  ;;  %v52_v4 = vmul.f32 %v51_v2, %v41_v1  ;;  %p139_p13 = por %p138_p12, %p137_p11 }
  0x26   :  { %v54_v5 = vmul.f32 %v53_v3, %v41_v1  ;;  %v59_v7 = vstv %s50_s30 }
  0x27   :  { %p140_p0 = pnand %p139_p13, %p133_p10 }
  0x28   :  { %v56_v6 = vrot.slane %v54_v5, 1 }
  0x2a   :  { %v58_v8 = vadd.f32 %v56_v6, %v52_v4 }
  0x2c   :  { %v60_v9 = vadd.f32 %v59_v7, %v58_v8 }
  0x2e   :  { %v62_v10 = vand.u32 2147483647, %v60_v9  ;;  %v61_v20 = vmax.f32 %v60_v9, 0.0 }
  0x30   :  { %v63_v11 = vsub.f32 0.0, %v62_v10 }
  0x32   :  { %v64_v12 = vmul.f32 1.442695, %v63_v11 }
  0x34   :  { %104 = vpow2.f32 %v64_v12 }
  0x3e   :  { %v105_v13 = vpop.eup %104 }
  0x3f   :  { %v66_v14 = vadd.f32 1.0, %v105_v13  ;;  %v69_v15 = vmul.f32 -0.5, %v105_v13  ;;  %v72_v17 = vand.u32 2147483647, %v105_v13 }
  0x41   :  { %106 = vlog2.f32 %v66_v14  ;;  %v70_v16 = vadd.f32 1.0, %v69_v15  ;;  %vm73_vm0 = vcmp.lt.f32.partialorder %v72_v17, 0.0004427343 }
  0x43   :  { %v71_v18 = vmul.f32 %v105_v13, %v70_v16 }
  0x4b   :  { %v107_v19 = vpop.eup %106 }
  0x4c   :  { %v68_v21 = vmul.f32 0.6931472, %v107_v19 }
  0x4e   :  { %v74_v22 = vsel %vm73_vm0, %v71_v18, %v68_v21 }
  0x4f   :  { %v75_v23 = vadd.f32 %v74_v22, %v61_v20 }
  0x51   :  { %v76_v24 = vsub.f32 0.0, %v75_v23  ;;  %v79_v25 = vsub.f32 %v60_v9, %v75_v23 }
  0x53   :  { %78 = vst.msk [vmem:[#allocation7] sm:$0x1] %vm77_vm1, %v76_v24  ;;  %80 = vst.msk [vmem:[#allocation7 + $0x1] sm:$0x1] %vm77_vm1, %v79_v25 }
  0x54   :  { %143 = shalt.err (!%p140_p0)
}
  0x55   :  { %s144_s8 = scalar_lea.hbm %s207_s3, 32 }
  0x56   :  { %p145_p1 = scmp.ne.s32.totalorder %s207_s3, %s144_s8  ;;  %p148_p2 = scmp.lt.u32.totalorder %s144_s8, %s207_s3 }
  0x58   :  { %p150_p3 = pnand %p148_p2, %p145_p1 }
  0x5a   :  { %153 = shalt.err (!%p150_p3)
}
  0x5b   :  { %90 = dma.vmem_to_hbm [thread:$0]  %s88_s4, 32, %s207_s3, [#allocation3]  }
  0x5c   :  { %158 = dma.done.wait [#allocation3], 32  }
  0x5d   :  { %159 = vsyncadd [#allocation3], 4294967264 }
  0x5e   :  { %94 = vsyncpa [#allocation3], 1 }
  0x5f   :  { %95 = vsyncpa [#allocation4], 1 }
  0x60   :  { %96 = vsyncpa [#allocation6], 1 }

</bundles_post_ra>
